<compile_context>
chip_gen: v5e
topology: v5e:2x2
jax: 0.10.0
libtpu: 0.0.40
codegen_flags: <defaults>
</compile_context>

<pallas_src>
import math

import jax
import jax.numpy as jnp
from jax import lax
from jax.experimental import pallas as pl
from jax.experimental.pallas import tpu as pltpu


def _round_up(x: int, m: int) -> int:
    return ((x + m - 1) // m) * m


def _linear_kernel(x_ref, w_ref, b_ref, o_ref, acc_ref):
    # x_ref:   (tm, tk)  activation tile
    # w_ref:   (tn, tk)  weight tile in PyTorch (out, in) layout
    # b_ref:   (1,  tn)  f32 bias tile
    # o_ref:   (tm, tn)  output tile
    # acc_ref: (tm, tn)  f32 accumulator scratch (persists across K steps)
    k = pl.program_id(2)

    @pl.when(k == 0)
    def _():
        acc_ref[...] = jnp.zeros_like(acc_ref)

    # Contract x's K (dim 1) against w's K (dim 1): (tm, tk) x (tn, tk) -> (tm, tn).
    # The MXU handles the transposed-RHS contraction natively; no transpose needed.
    acc_ref[...] += lax.dot_general(
        x_ref[...], w_ref[...],
        dimension_numbers=(((1,), (1,)), ((), ())),
        preferred_element_type=jnp.float32,
    )

    @pl.when(k == pl.num_programs(2) - 1)
    def _():
        o_ref[...] = (acc_ref[...] + b_ref[...]).astype(o_ref.dtype)


def lazy_linear(x, weight, bias=None, *, tm_max=256, tn_max=512, tk_max=512):
    """F.linear(x, weight, bias) with the matmul + bias done in a Pallas kernel.

    x:      (..., in_features)
    weight: (out_features, in_features)   -- PyTorch layout, used as-is
    bias:   (out_features,) or None
    """
    *lead, K = x.shape
    N, Kw = weight.shape
    assert Kw == K, f"weight in_features {Kw} != input last dim {K}"

    x2d = x.reshape(-1, K)
    M = x2d.shape[0]

    # Tile sizes: lane dim (last) multiples of 128, sublane multiples of 8;
    # shrink to the (rounded-up) problem size when the problem is small.
    tm = min(tm_max, _round_up(M, 8))
    tn = min(tn_max, _round_up(N, 128))
    tk = min(tk_max, _round_up(K, 128))

    M_pad = _round_up(M, tm)
    N_pad = _round_up(N, tn)
    K_pad = _round_up(K, tk)

    # Zero-pad to tile multiples (exact for matmul + bias; padding sliced off).
    if (M_pad, K_pad) != (M, K):
        x2d = jnp.pad(x2d, ((0, M_pad - M), (0, K_pad - K)))
    if (N_pad, K_pad) != (N, K):
        w = jnp.pad(weight, ((0, N_pad - N), (0, K_pad - K)))
    else:
        w = weight

    # Bias kept in f32 inside the kernel (added to the f32 accumulator).
    if bias is None:
        b2d = jnp.zeros((1, N_pad), dtype=jnp.float32)
    else:
        b2d = jnp.pad(bias.astype(jnp.float32).reshape(1, N),
                      ((0, 0), (0, N_pad - N)))

    grid = (M_pad // tm, N_pad // tn, K_pad // tk)

    bytes_accessed = (
        x2d.size * x2d.dtype.itemsize
        + w.size * w.dtype.itemsize
        + b2d.size * b2d.dtype.itemsize
        + M_pad * N_pad * jnp.dtype(x.dtype).itemsize
    )
    cost = pl.CostEstimate(
        flops=2 * M_pad * N_pad * K_pad,
        transcendentals=0,
        bytes_accessed=bytes_accessed,
    )

    out2d = pl.pallas_call(
        _linear_kernel,
        out_shape=jax.ShapeDtypeStruct((M_pad, N_pad), x.dtype),
        grid_spec=pltpu.PrefetchScalarGridSpec(
            num_scalar_prefetch=0,
            grid=grid,
            in_specs=[
                pl.BlockSpec((tm, tk), lambda i, j, k: (i, k)),   # activations
                pl.BlockSpec((tn, tk), lambda i, j, k: (j, k)),   # weight (N,K)
                pl.BlockSpec((1, tn), lambda i, j, k: (0, j)),    # f32 bias row
            ],
            out_specs=pl.BlockSpec((tm, tn), lambda i, j, k: (i, j)),
            scratch_shapes=[pltpu.VMEM((tm, tn), jnp.float32)],
        ),
        compiler_params=pltpu.CompilerParams(
            dimension_semantics=("parallel", "parallel", "arbitrary"),
            vmem_limit_bytes=64 * 1024 * 1024,
        ),
        cost_estimate=cost,
    )(x2d, w, b2d)

    return out2d[:M, :N].reshape(*lead, N)


def init_lazy_linear_params(key, in_features, out_features, dtype=jnp.float32):
    """Deterministic re-implementation of LazyLinear.reset_parameters():
    kaiming_uniform_(weight, a=sqrt(5)) -> U(-1/sqrt(fan_in), 1/sqrt(fan_in)),
    bias ~ U(-1/sqrt(fan_in), 1/sqrt(fan_in))."""
    kw, kb = jax.random.split(key)
    fan_in = in_features
    bound = 1.0 / math.sqrt(fan_in)
    weight = jax.random.uniform(kw, (out_features, in_features), dtype,
                                minval=-bound, maxval=bound)
    bias = jax.random.uniform(kb, (out_features,), dtype,
                              minval=-bound, maxval=bound)
    return weight, bias


if __name__ == "__main__":
    key = jax.random.PRNGKey(0)
    kx, kp, kx2, kp2 = jax.random.split(key, 4)

    # Small demo shape matching the module's forward (batch, seq, features).
    batch, seq, in_features, out_features = 2, 8, 32, 16
    x = jax.random.normal(kx, (batch, seq, in_features), dtype=jnp.float32)
    weight, bias = init_lazy_linear_params(kp, in_features, out_features)

    y = lazy_linear(x, weight, bias)
    y = jax.block_until_ready(y)
    y_ref = x @ weight.T + bias
    assert y.shape == (batch, seq, out_features)
    assert jnp.allclose(y, y_ref, atol=1e-5, rtol=1e-5)

    # Second check: non-tile-aligned sizes exercising the padding path and a
    # multi-tile M grid (still small).
    M2, K2, N2 = 300, 200, 130
    x2 = jax.random.normal(kx2, (M2, K2), dtype=jnp.float32)
    w2, b2 = init_lazy_linear_params(kp2, K2, N2)
    y2 = jax.block_until_ready(lazy_linear(x2, w2, b2))
    y2_ref = x2 @ w2.T + b2
    assert y2.shape == (M2, N2)
    assert jnp.allclose(y2, y2_ref, atol=1e-4, rtol=1e-4)

    # No-bias path (LazyLinear(bias=False)).
    y3 = jax.block_until_ready(lazy_linear(x2, w2, None))
    assert jnp.allclose(y3, x2 @ w2.T, atol=1e-4, rtol=1e-4)

    print("KERNEL_OK")
</pallas_src>

<mosaic_0001>
module attributes {stable_mosaic.version = 11 : i64} {
  func.func @_linear_kernel(%arg0: i32, %arg1: i32, %arg2: i32, %arg3: memref<16x128xf32, #tpu.memory_space<vmem>>, %arg4: memref<128x128xf32, #tpu.memory_space<vmem>>, %arg5: memref<1x128xf32, #tpu.memory_space<vmem>>, %arg6: memref<16x128xf32, #tpu.memory_space<vmem>>, %arg7: memref<16x128xf32, #tpu.memory_space<vmem>>) attributes {dimension_semantics = [#tpu.dimension_semantics<parallel>, #tpu.dimension_semantics<parallel>, #tpu.dimension_semantics<arbitrary>], iteration_bounds = array<i64: 1, 1, 1>, scalar_prefetch = 0 : i64, scratch_operands = 1 : i64, tpu.core_type = #tpu.core_type<tc>, window_params = [{transform_indices = @transform_0, window_bounds = array<i64: 16, 128>}, {transform_indices = @transform_1, window_bounds = array<i64: 128, 128>}, {transform_indices = @transform_2, window_bounds = array<i64: 1, 128>}, {transform_indices = @transform_3, window_bounds = array<i64: 16, 128>}]} {
    %c0_i32 = arith.constant 0 : i32
    %0 = arith.cmpi eq, %arg2, %c0_i32 : i32
    %1 = arith.extui %0 : i1 to i32
    %c0_i32_0 = arith.constant 0 : i32
    %2 = arith.cmpi ne, %1, %c0_i32_0 : i32
    scf.if %2 {
      %cst_10 = arith.constant 0.000000e+00 : f32
      %12 = vector.broadcast %cst_10 : f32 to vector<16x128xf32>
      %c0_11 = arith.constant 0 : index
      %c0_12 = arith.constant 0 : index
      %13 = vector.load %arg7[%c0_11, %c0_12] : memref<16x128xf32, #tpu.memory_space<vmem>>, vector<16x128xf32>
      tpu.vector_store %arg7[%c0_11, %c0_12], %12 {strides = array<i32>} : memref<16x128xf32, #tpu.memory_space<vmem>>, vector<16x128xf32>,
    } else {
    }
    %c0 = arith.constant 0 : index
    %c0_1 = arith.constant 0 : index
    %3 = vector.load %arg7[%c0, %c0_1] : memref<16x128xf32, #tpu.memory_space<vmem>>, vector<16x128xf32>
    %c0_2 = arith.constant 0 : index
    %c0_3 = arith.constant 0 : index
    %4 = vector.load %arg3[%c0_2, %c0_3] : memref<16x128xf32, #tpu.memory_space<vmem>>, vector<16x128xf32>
    %c0_4 = arith.constant 0 : index
    %c0_5 = arith.constant 0 : index
    %5 = vector.load %arg4[%c0_4, %c0_5] : memref<128x128xf32, #tpu.memory_space<vmem>>, vector<128x128xf32>
    %cst = arith.constant dense<0.000000e+00> : vector<16x128xf32>
    %6 = tpu.matmul %4, %5, %cst {dimension_numbers = #tpu.dot_dimension_numbers<[1], [1], [0], [0], [0, 0, 1, 0], [], []>} : vector<16x128xf32>, vector<128x128xf32>, vector<16x128xf32> -> vector<16x128xf32>
    %7 = arith.addf %3, %6 : vector<16x128xf32>
    %c0_6 = arith.constant 0 : index
    %c0_7 = arith.constant 0 : index
    %8 = vector.load %arg7[%c0_6, %c0_7] : memref<16x128xf32, #tpu.memory_space<vmem>>, vector<16x128xf32>
    tpu.vector_store %arg7[%c0_6, %c0_7], %7 {strides = array<i32>} : memref<16x128xf32, #tpu.memory_space<vmem>>, vector<16x128xf32>,
    %c0_i32_8 = arith.constant 0 : i32
    %9 = arith.cmpi eq, %arg2, %c0_i32_8 : i32
    %10 = arith.extui %9 : i1 to i32
    %c0_i32_9 = arith.constant 0 : i32
    %11 = arith.cmpi ne, %10, %c0_i32_9 : i32
    scf.if %11 {
      %c0_10 = arith.constant 0 : index
      %c0_11 = arith.constant 0 : index
      %12 = vector.load %arg7[%c0_10, %c0_11] : memref<16x128xf32, #tpu.memory_space<vmem>>, vector<16x128xf32>
      %c0_12 = arith.constant 0 : index
      %c0_13 = arith.constant 0 : index
      %13 = vector.load %arg5[%c0_12, %c0_13] : memref<1x128xf32, #tpu.memory_space<vmem>>, vector<1x128xf32>
      %14 = vector.broadcast %13 : vector<1x128xf32> to vector<16x128xf32>
      %15 = arith.addf %12, %14 : vector<16x128xf32>
      %c0_14 = arith.constant 0 : index
      %c0_15 = arith.constant 0 : index
      %16 = vector.load %arg6[%c0_14, %c0_15] : memref<16x128xf32, #tpu.memory_space<vmem>>, vector<16x128xf32>
      tpu.vector_store %arg6[%c0_14, %c0_15], %15 {strides = array<i32>} : memref<16x128xf32, #tpu.memory_space<vmem>>, vector<16x128xf32>,
    } else {
    }
    return
  }
  func.func @transform_0(%arg0: i32, %arg1: i32, %arg2: i32) -> (i32, i32) {
    %c0_i32 = arith.constant 0 : i32
    return %arg0, %arg2 : i32, i32
  }
  func.func @transform_1(%arg0: i32, %arg1: i32, %arg2: i32) -> (i32, i32) {
    %c0_i32 = arith.constant 0 : i32
    return %arg1, %arg2 : i32, i32
  }
  func.func @transform_2(%arg0: i32, %arg1: i32, %arg2: i32) -> (i32, i32) {
    %c0_i32 = arith.constant 0 : i32
    %c0_i32_0 = arith.constant 0 : i32
    return %c0_i32, %arg1 : i32, i32
  }
  func.func @transform_3(%arg0: i32, %arg1: i32, %arg2: i32) -> (i32, i32) {
    %c0_i32 = arith.constant 0 : i32
    return %arg0, %arg1 : i32, i32
  }
}

</mosaic_0001>

<bundles_post_ra>
// kernel: tpu_custom_call.1
= control target key start
LH: loop header
LB: loop body
LE: loop exit
PB: predicated region body
PF: predicated region fallthrough
CT: control target
= control target key end

     0   :  { %8 = vsyncpa [#allocation4], 0  ;;  %s279_s0 = inlined_call_operand.hbm [shape: f32[16,128], index: 0, kind: input, shape index: {}]   ;;  %s280_s1 = inlined_call_operand.hbm [shape: f32[128,128], index: 1, kind: input, shape index: {}]   ;;  %s281_s2 = inlined_call_operand.vmem [shape: f32[1,128], index: 2, kind: input, shape index: {}]   ;;  %s282_s3 = inlined_call_operand.hbm [shape: f32[16,128], index: 3, kind: output, shape index: {}]  }
   0x1   :  { %9 = vsyncpa [#allocation7], 0 }
   0x2   :  { %10 = vsyncpa [#allocation5], 0  ;;  %s15_s14 = sshll.u32 %s279_s0, 4  ;;  %s233_s15 = smov [#allocation3]   ;;  %s16_s14 = int_to_ptr.hbm [resolvable:$true] %s15_s14 }
   0x3   :  { %s17_s16 = sshll.u32 %s233_s15, 4  ;;  %s28_s19 = sshll.u32 %s280_s1, 4  ;;  %s18_s16 = int_to_ptr.vmem [resolvable:$true] %s17_s16  ;;  %s29_s19 = int_to_ptr.hbm [resolvable:$true] %s28_s19 }
   0x4   :  { %s234_s20 = smov 128   ;;  %s235_s21 = smov 8  }
   0x5   :  { %23 = dma.hbm_to_vmem [thread:$0]  %s16_s14, 256, %s18_s16, [#allocation4], %s234_s20, %s234_s20, %s235_s21  }
   0x6   :  { %s236_s22 = smov [#allocation6]  }
   0x7   :  { %s30_s23 = sshll.u32 %s236_s22, 4  ;;  %s31_s23 = int_to_ptr.vmem [resolvable:$true] %s30_s23 }
   0x8   :  { %36 = dma.hbm_to_vmem [thread:$0]  %s29_s19, 2048, %s31_s23, [#allocation7], %s234_s20, %s234_s20, %s235_s21  }
   0x9   :  { %227 = dma.done.wait [#allocation4], 256  }
   0xa   :  { %228 = vsyncadd [#allocation4], 4294967040 }
   0xb   :  { %229 = dma.done.wait [#allocation7], 2048  }
   0xc   :  { %230 = vsyncadd [#allocation7], 4294965248  ;;  %v72_v0 = vld [vmem:[#allocation6 + $0x78] sm:$0xff]  ;;  %v71_v1 = vld [vmem:[#allocation6 + $0x70] sm:$0xff]  ;;  %s237_s24 = smov [#allocation8]   ;;  %s119_s28 = sshll.u32 %s282_s3, 4  ;;  %s120_s28 = int_to_ptr.hbm [resolvable:$true] %s119_s28 }
   0xd   :  { %73 = vmatpush.xpose.msra.mxu0 %v72_v0  ;;  %133 = vmatpush.xpose.msra.mxu1 %v72_v0  ;;  %v70_v2 = vld [vmem:[#allocation6 + $0x68] sm:$0xff]  ;;  %v69_v3 = vld [vmem:[#allocation6 + $0x60] sm:$0xff]  ;;  %v68_v4 = vld [vmem:[#allocation6 + $0x58] sm:$0xff]  ;;  %s117_s25 = sshll.u32 %s237_s24, 4  ;;  %s118_s25 = int_to_ptr.vmem [resolvable:$true] %s117_s25 }
   0xe   :  { %v67_v5 = vld [vmem:[#allocation6 + $0x50] sm:$0xff]  ;;  %v66_v6 = vld [vmem:[#allocation6 + $0x48] sm:$0xff]  ;;  %v65_v7 = vld [vmem:[#allocation6 + $0x40] sm:$0xff] }
   0xf   :  { %v64_v8 = vld [vmem:[#allocation6 + $0x38] sm:$0xff]  ;;  %v63_v9 = vld [vmem:[#allocation6 + $0x30] sm:$0xff]  ;;  %v62_v10 = vld [vmem:[#allocation6 + $0x28] sm:$0xff] }
  0x10   :  { %v61_v11 = vld [vmem:[#allocation6 + $0x20] sm:$0xff]  ;;  %v60_v12 = vld [vmem:[#allocation6 + $0x18] sm:$0xff]  ;;  %v59_v13 = vld [vmem:[#allocation6 + $0x10] sm:$0xff] }
  0x11   :  { %74 = vmatpush.xpose.msra.mxu0 %v71_v1  ;;  %134 = vmatpush.xpose.msra.mxu1 %v71_v1  ;;  %v58_v14 = vld [vmem:[#allocation6 + $0x8] sm:$0xff]  ;;  %v57_v15 = vld [vmem:[#allocation6] sm:$0xff]  ;;  %v55_v16 = vld [vmem:[#allocation3] sm:$0xff] }
  0x12   :  { %v56_v17 = vld [vmem:[#allocation3 + $0x8] sm:$0xff]  ;;  %v154_v18 = vld [vmem:[%s281_s2] ss:$0 sm:$0xff] }
  0x15   :  { %75 = vmatpush.xpose.msra.mxu0 %v70_v2  ;;  %135 = vmatpush.xpose.msra.mxu1 %v70_v2 }
  0x19   :  { %76 = vmatpush.xpose.msra.mxu0 %v69_v3  ;;  %136 = vmatpush.xpose.msra.mxu1 %v69_v3 }
  0x1d   :  { %77 = vmatpush.xpose.msra.mxu0 %v68_v4  ;;  %137 = vmatpush.xpose.msra.mxu1 %v68_v4 }
  0x21   :  { %78 = vmatpush.xpose.msra.mxu0 %v67_v5  ;;  %138 = vmatpush.xpose.msra.mxu1 %v67_v5 }
  0x25   :  { %79 = vmatpush.xpose.msra.mxu0 %v66_v6  ;;  %139 = vmatpush.xpose.msra.mxu1 %v66_v6 }
  0x29   :  { %80 = vmatpush.xpose.msra.mxu0 %v65_v7  ;;  %140 = vmatpush.xpose.msra.mxu1 %v65_v7 }
  0x2d   :  { %81 = vmatpush.xpose.msra.mxu0 %v64_v8  ;;  %141 = vmatpush.xpose.msra.mxu1 %v64_v8 }
  0x31   :  { %82 = vmatpush.xpose.msra.mxu0 %v63_v9  ;;  %142 = vmatpush.xpose.msra.mxu1 %v63_v9 }
  0x35   :  { %83 = vmatpush.xpose.msra.mxu0 %v62_v10  ;;  %143 = vmatpush.xpose.msra.mxu1 %v62_v10 }
  0x39   :  { %84 = vmatpush.xpose.msra.mxu0 %v61_v11  ;;  %144 = vmatpush.xpose.msra.mxu1 %v61_v11 }
  0x3d   :  { %85 = vmatpush.xpose.msra.mxu0 %v60_v12  ;;  %145 = vmatpush.xpose.msra.mxu1 %v60_v12 }
  0x41   :  { %86 = vmatpush.xpose.msra.mxu0 %v59_v13  ;;  %146 = vmatpush.xpose.msra.mxu1 %v59_v13 }
  0x45   :  { %87 = vmatpush.xpose.msra.mxu0 %v58_v14  ;;  %147 = vmatpush.xpose.msra.mxu1 %v58_v14 }
  0x49   :  { %88 = vmatpush.xpose.msra.mxu0 %v57_v15  ;;  %148 = vmatpush.xpose.msra.mxu1 %v57_v15 }
  0x4c   :  { %89 = vmatmul.f32.vlgmr.msra.gmra.mxu0 %v55_v16  ;;  %92 = vmatmul.f32.vlgmr.msra.gmra.mxu1 %v56_v17 }
  0xc9   :  { %v90_v19 = vpop.f32.mrf.mxu0  ;;  %v93_v20 = vpop.f32.mrf.mxu1 }
  0xca   :  { %v109_v21 = vadd.f32 %v154_v18, %v90_v19  ;;  %v110_v22 = vadd.f32 %v154_v18, %v93_v20 }
  0xcc   :  { %111 = vst [vmem:[#allocation8] sm:$0xff] %v109_v21 }
  0xcd   :  { %112 = vst [vmem:[#allocation8 + $0x8] sm:$0xff] %v110_v22 }
  0xce   :  { %125 = dma.vmem_to_hbm [thread:$0]  %s118_s25, 256, %s120_s28, [#allocation5], %s234_s20, %s234_s20, %s235_s21  }
  0xcf   :  { %231 = dma.done.wait [#allocation5], 256  }
  0xd0   :  { %232 = vsyncadd [#allocation5], 4294967040 }
  0xd1   :  { %130 = vsyncpa [#allocation4], 1 }
  0xd2   :  { %131 = vsyncpa [#allocation7], 1 }
  0xd3   :  { %132 = vsyncpa [#allocation5], 1 }

</bundles_post_ra>
